<compile_context>
chip_gen: v6e
topology: v6e:2x2x1
jax: 0.10.0
libtpu: 0.0.40
codegen_flags: <defaults>
</compile_context>

<pallas_src>
import jax
import jax.numpy as jnp
from jax.experimental import pallas as pl
from jax.experimental.pallas import tpu as pltpu


def _fused_kernel(feat_ref, subj_ref, wf_ref, bf_ref, ws_ref, bs_ref, wa_ref,
                  out_ref, ps_ref):
    """One sequence tile of the fused scores+softmax computation.

    feat_ref : (TS, B*F) tile of the (S, B*F) row-major feature view
               (row s holds [x[s,0,:F], x[s,1,:F], ..., x[s,B-1,:F]]).
    subj_ref : (B, E) subject embeddings (resident).
    wf/bf    : (F, P), (1, P)   proj_feature weight / bias (resident).
    ws/bs    : (E, P), (1, P)   proj_subject weight / bias (resident).
    wa       : (1, P)           attention-head weight row vector (resident).
    out_ref  : (S, B)           resident output block (raw scores, then
                                normalized in the last-step epilogue).
    ps_ref   : (B, P)           VMEM scratch holding the subject projection.
    """
    j = pl.program_id(0)
    TS = feat_ref.shape[0]
    B, _ = subj_ref.shape
    F, _ = wf_ref.shape

    # Subject projection hoisted out of the per-tile body: computed once on
    # grid step 0 into a persistent VMEM scratch (tiny (B,E)@(E,P) matmul).
    @pl.when(j == 0)
    def _():
        ps_ref[...] = (
            jnp.dot(subj_ref[...], ws_ref[...], preferred_element_type=jnp.float32)
            + bs_ref[...]
        )

    wf = wf_ref[...]                       # (F, P)
    bf = bf_ref[...]                       # (1, P)
    wa = wa_ref[...]                       # (1, P)

    row0 = j * TS
    if TS % 8 == 0:                        # sublane-aligned store hint
        row0 = pl.multiple_of(row0, 8)

    # Static unroll over the (small) batch dimension.  Each iteration is a
    # contiguous lane slice + one MXU matmul + VPU/EUP elementwise work; trace
    # size grows linearly with B (fine for this module's typical batch sizes).
    for b in range(B):
        fb = feat_ref[:, b * F:(b + 1) * F]                       # (TS, F)
        pf = jnp.dot(fb, wf, preferred_element_type=jnp.float32) + bf     # (TS, P)  MXU
        h = jnp.tanh(pf + ps_ref[b:b + 1, :])                     # (TS, P)  EUP
        # Attention head: VPU multiply + lane reduction (wa kept as (1, P)).
        sc = jnp.sum(h * wa, axis=-1, keepdims=True)              # (TS, 1)
        out_ref[pl.ds(row0, TS), pl.ds(b, 1)] = sc
    # NOTE: the attention bias `ba` is intentionally omitted here: softmax over
    # the sequence axis is invariant to adding the same scalar to every score.

    # Fused softmax-over-S epilogue on the resident (S, B) block.
    @pl.when(j == pl.num_programs(0) - 1)
    def _():
        s = out_ref[...]                                          # (S, B)
        m = jnp.max(s, axis=0, keepdims=True)
        e = jnp.exp(s - m)
        d = jnp.sum(e, axis=0, keepdims=True)
        r = pl.reciprocal(d, approx=True)                         # EUP vrcp
        r = r * (2.0 - d * r)                                     # one Newton step
        out_ref[...] = e * r


def _round_up(x, m):
    return -(-x // m) * m


def _pick_seq_tile(S, B, F, E, P, vmem_limit):
    """Largest sequence-tile TS (divisor of S, multiple of 8 unless TS == S)
    whose streamed tile + intermediates fit the per-generation VMEM budget."""
    lane = 128
    bf_pad = _round_up(B * F, lane)        # lane width of the streamed tile
    f_pad = _round_up(F, lane)
    p_pad = _round_up(P, lane)
    e_pad = _round_up(E, lane)

    # Resident allocations (fetched once / live for the whole kernel).
    resident = 4 * (
        _round_up(S, 8) * lane             # (S, B) output block (B lane-pads to 128)
        + _round_up(F, 8) * p_pad          # wf
        + _round_up(E, 8) * p_pad          # ws
        + _round_up(B, 8) * e_pad          # subject embedding
        + 3 * 8 * p_pad                    # bf, bs, wa
        + _round_up(B, 8) * p_pad          # ps scratch
    )
    # Per-sequence-position streaming / live-intermediate bytes:
    #   2 x double-buffered feature rows + (fb, pf, h, products, sc) for one b.
    per_s = 4 * (2 * bf_pad + f_pad + 4 * p_pad)

    budget = vmem_limit - resident - (2 << 20)        # 2 MiB slack
    ts_max = max(budget // per_s, 1)
    if ts_max >= S:
        return S                                      # single grid step

    # Largest divisor of S that is <= ts_max and a multiple of 8 (block-shape rule).
    best = 0
    d = 1
    while d * d <= S:
        if S % d == 0:
            for t in (d, S // d):
                if t <= ts_max and t % 8 == 0 and t > best:
                    best = t
        d += 1
    # Fallback: a single full-S block (always a legal block shape; may need the
    # full vmem_limit for pathological, indivisible S).
    return best if best > 0 else S


@jax.jit
def subject_attention(features, subject_embedding, params):
    S, B, F = features.shape
    E = subject_embedding.shape[1]
    P = params["wf"].shape[1]

    # Per-generation VMEM budget (64 MiB physical on v7x, 128 MiB on v5e/v6e).
    try:
        vmem_cap = int(pltpu.get_tpu_info().vmem_capacity_bytes)
    except Exception:
        vmem_cap = 64 * 1024 * 1024        # conservative v7x default
    vmem_limit = int(vmem_cap * 0.85)

    TS = _pick_seq_tile(S, B, F, E, P, vmem_limit)
    num_tiles = S // TS                    # TS divides S (or TS == S)

    # Free, contiguous row-major view: row s = [x[s,0,:], ..., x[s,B-1,:]].
    feat2 = features.reshape(S, B * F)

    out = pl.pallas_call(
        _fused_kernel,
        out_shape=jax.ShapeDtypeStruct((S, B), jnp.float32),
        grid_spec=pltpu.PrefetchScalarGridSpec(
            num_scalar_prefetch=0,
            grid=(num_tiles,),
            in_specs=[
                pl.BlockSpec((TS, B * F), lambda j: (j, 0)),   # streamed features
                pl.BlockSpec((B, E), lambda j: (0, 0)),        # subject embedding
                pl.BlockSpec((F, P), lambda j: (0, 0)),        # wf
                pl.BlockSpec((1, P), lambda j: (0, 0)),        # bf
                pl.BlockSpec((E, P), lambda j: (0, 0)),        # ws
                pl.BlockSpec((1, P), lambda j: (0, 0)),        # bs
                pl.BlockSpec((1, P), lambda j: (0, 0)),        # wa
            ],
            # Resident accumulator block: softmax epilogue needs the scores of
            # all tiles, so this grid axis must be "arbitrary".
            out_specs=pl.BlockSpec((S, B), lambda j: (0, 0)),
            scratch_shapes=[pltpu.VMEM((B, P), jnp.float32)],  # subject projection
        ),
        compiler_params=pltpu.CompilerParams(
            dimension_semantics=("arbitrary",),
            vmem_limit_bytes=vmem_limit,
        ),
    )(feat2, subject_embedding,
      params["wf"], params["bf"], params["ws"], params["bs"], params["wa"])

    return out                                             # (S, B), as in PyTorch


def init_params(key, feature_size, subject_embedding_size, project_size):
    # nn.Linear weights: normal(std=0.01); biases zero (per init_weights()).
    # Weights stored pre-transposed (in_features, out_features); the P->1
    # attention head is stored as a (1, P) row vector for the VPU lane-reduce.
    k1, k2, k3 = jax.random.split(key, 3)
    return {
        "wf": 0.01 * jax.random.normal(k1, (feature_size, project_size), jnp.float32),
        "bf": jnp.zeros((1, project_size), jnp.float32),
        "ws": 0.01 * jax.random.normal(k2, (subject_embedding_size, project_size), jnp.float32),
        "bs": jnp.zeros((1, project_size), jnp.float32),
        "wa": 0.01 * jax.random.normal(k3, (1, project_size), jnp.float32),
        "ba": jnp.zeros((1, 1), jnp.float32),  # kept for API fidelity; cancels under softmax
    }


def reference(features, subject_embedding, params):
    pf = features @ params["wf"] + params["bf"][0]                       # (S, B, P)
    ps = subject_embedding @ params["ws"] + params["bs"][0]              # (B, P)
    h = jnp.tanh(pf + ps[None])
    scores = jnp.sum(h * params["wa"][0], axis=-1) + params["ba"][0, 0]  # (S, B)
    return jax.nn.softmax(scores, axis=0)


if __name__ == "__main__":
    S, B = 8, 2                       # sequence length, batch
    feature_size = 32
    subject_embedding_size = 16
    project_size = 32

    key = jax.random.PRNGKey(0)
    kf, ks, kp = jax.random.split(key, 3)
    features = jax.random.normal(kf, (S, B, feature_size), jnp.float32)
    subject_embedding = jax.random.normal(ks, (B, subject_embedding_size), jnp.float32)
    params = init_params(kp, feature_size, subject_embedding_size, project_size)

    out = subject_attention(features, subject_embedding, params)
    out = jax.block_until_ready(out)

    ref = reference(features, subject_embedding, params)
    assert out.shape == (S, B)
    # 1e-4 tolerance: the only drift source vs. the exact f32 reference is the
    # EUP approximate reciprocal (+ one Newton refinement) in the softmax.
    assert jnp.allclose(out, ref, atol=1e-4, rtol=1e-4), "mismatch vs reference"
    # attention weights sum to 1 along the sequence dimension
    assert jnp.allclose(jnp.sum(out, axis=0), jnp.ones((B,)), atol=1e-4)

    print("KERNEL_OK")
</pallas_src>

<mosaic_0001>
module attributes {stable_mosaic.version = 11 : i64} {
  func.func @_fused_kernel(%arg0: i32, %arg1: memref<8x64xf32, #tpu.memory_space<vmem>>, %arg2: memref<2x16xf32, #tpu.memory_space<vmem>>, %arg3: memref<32x32xf32, #tpu.memory_space<vmem>>, %arg4: memref<1x32xf32, #tpu.memory_space<vmem>>, %arg5: memref<16x32xf32, #tpu.memory_space<vmem>>, %arg6: memref<1x32xf32, #tpu.memory_space<vmem>>, %arg7: memref<1x32xf32, #tpu.memory_space<vmem>>, %arg8: memref<8x2xf32, #tpu.memory_space<vmem>>, %arg9: memref<2x32xf32, #tpu.memory_space<vmem>>) attributes {dimension_semantics = [#tpu.dimension_semantics<arbitrary>], iteration_bounds = array<i64: 1>, scalar_prefetch = 0 : i64, scratch_operands = 1 : i64, tpu.core_type = #tpu.core_type<tc>, window_params = [{transform_indices = @transform_0, window_bounds = array<i64: 8, 64>}, {pipeline_mode = #tpu.pipeline_mode<synchronous>, transform_indices = @transform_1, window_bounds = array<i64: 2, 16>}, {pipeline_mode = #tpu.pipeline_mode<synchronous>, transform_indices = @transform_2, window_bounds = array<i64: 32, 32>}, {pipeline_mode = #tpu.pipeline_mode<synchronous>, transform_indices = @transform_3, window_bounds = array<i64: 1, 32>}, {pipeline_mode = #tpu.pipeline_mode<synchronous>, transform_indices = @transform_4, window_bounds = array<i64: 16, 32>}, {pipeline_mode = #tpu.pipeline_mode<synchronous>, transform_indices = @transform_5, window_bounds = array<i64: 1, 32>}, {pipeline_mode = #tpu.pipeline_mode<synchronous>, transform_indices = @transform_6, window_bounds = array<i64: 1, 32>}, {pipeline_mode = #tpu.pipeline_mode<synchronous>, transform_indices = @transform_7, window_bounds = array<i64: 8, 2>}]} {
    %c0_i32 = arith.constant 0 : i32
    %0 = arith.cmpi eq, %arg0, %c0_i32 : i32
    %1 = arith.extui %0 : i1 to i32
    %c0_i32_0 = arith.constant 0 : i32
    %2 = arith.cmpi ne, %1, %c0_i32_0 : i32
    scf.if %2 {
      %c0_19 = arith.constant 0 : index
      %c0_20 = arith.constant 0 : index
      %39 = vector.load %arg2[%c0_19, %c0_20] : memref<2x16xf32, #tpu.memory_space<vmem>>, vector<2x16xf32>
      %c0_21 = arith.constant 0 : index
      %c0_22 = arith.constant 0 : index
      %40 = vector.load %arg5[%c0_21, %c0_22] : memref<16x32xf32, #tpu.memory_space<vmem>>, vector<16x32xf32>
      %cst_23 = arith.constant dense<0.000000e+00> : vector<2x32xf32>
      %41 = tpu.matmul %39, %40, %cst_23 {dimension_numbers = #tpu.dot_dimension_numbers<[1], [0], [0], [1], [0, 0, 1, 1], [], []>} : vector<2x16xf32>, vector<16x32xf32>, vector<2x32xf32> -> vector<2x32xf32>
      %c0_24 = arith.constant 0 : index
      %c0_25 = arith.constant 0 : index
      %42 = vector.load %arg6[%c0_24, %c0_25] : memref<1x32xf32, #tpu.memory_space<vmem>>, vector<1x32xf32>
      %43 = vector.broadcast %42 : vector<1x32xf32> to vector<2x32xf32>
      %44 = arith.addf %41, %43 : vector<2x32xf32>
      %c0_26 = arith.constant 0 : index
      %c0_27 = arith.constant 0 : index
      %45 = vector.load %arg9[%c0_26, %c0_27] : memref<2x32xf32, #tpu.memory_space<vmem>>, vector<2x32xf32>
      tpu.vector_store %arg9[%c0_26, %c0_27], %44 {strides = array<i32>} : memref<2x32xf32, #tpu.memory_space<vmem>>, vector<2x32xf32>,
    } else {
    }
    %c0 = arith.constant 0 : index
    %c0_1 = arith.constant 0 : index
    %3 = vector.load %arg3[%c0, %c0_1] : memref<32x32xf32, #tpu.memory_space<vmem>>, vector<32x32xf32>
    %c0_2 = arith.constant 0 : index
    %c0_3 = arith.constant 0 : index
    %4 = vector.load %arg4[%c0_2, %c0_3] : memref<1x32xf32, #tpu.memory_space<vmem>>, vector<1x32xf32>
    %c0_4 = arith.constant 0 : index
    %c0_5 = arith.constant 0 : index
    %5 = vector.load %arg7[%c0_4, %c0_5] : memref<1x32xf32, #tpu.memory_space<vmem>>, vector<1x32xf32>
    %c8_i32 = arith.constant 8 : i32
    %6 = arith.muli %arg0, %c8_i32 : i32
    %7 = tpu.assume_multiple %6, 8 : i32
    %c0_6 = arith.constant 0 : index
    %c0_7 = arith.constant 0 : index
    %8 = vector.load %arg1[%c0_6, %c0_7] : memref<8x64xf32, #tpu.memory_space<vmem>>, vector<8x32xf32>
    %cst = arith.constant dense<0.000000e+00> : vector<8x32xf32>
    %9 = tpu.matmul %8, %3, %cst {dimension_numbers = #tpu.dot_dimension_numbers<[1], [0], [0], [1], [0, 0, 1, 1], [], []>} : vector<8x32xf32>, vector<32x32xf32>, vector<8x32xf32> -> vector<8x32xf32>
    %10 = vector.broadcast %4 : vector<1x32xf32> to vector<8x32xf32>
    %11 = arith.addf %9, %10 : vector<8x32xf32>
    %c0_8 = arith.constant 0 : index
    %c0_9 = arith.constant 0 : index
    %12 = vector.load %arg9[%c0_8, %c0_9] : memref<2x32xf32, #tpu.memory_space<vmem>>, vector<1x32xf32>
    %13 = vector.broadcast %12 : vector<1x32xf32> to vector<8x32xf32>
    %14 = arith.addf %11, %13 : vector<8x32xf32>
    %15 = math.tanh %14 : vector<8x32xf32>
    %16 = vector.broadcast %5 : vector<1x32xf32> to vector<8x32xf32>
    %17 = arith.mulf %15, %16 : vector<8x32xf32>
    %cst_10 = arith.constant dense<0.000000e+00> : vector<8xf32>
    %18 = vector.multi_reduction <add>, %17, %cst_10 [1] : vector<8x32xf32> to vector<8xf32>
    %19 = vector.shape_cast %18 : vector<8xf32> to vector<8x1xf32>
    %20 = arith.index_cast %7 : i32 to index
    %c0_11 = arith.constant 0 : index
    %21 = vector.load %arg8[%20, %c0_11] : memref<8x2xf32, #tpu.memory_space<vmem>>, vector<8x1xf32>
    tpu.vector_store %arg8[%20, %c0_11], %19 {strides = array<i32>} : memref<8x2xf32, #tpu.memory_space<vmem>>, vector<8x1xf32>,
    %c0_12 = arith.constant 0 : index
    %c32 = arith.constant 32 : index
    %22 = vector.load %arg1[%c0_12, %c32] : memref<8x64xf32, #tpu.memory_space<vmem>>, vector<8x32xf32>
    %cst_13 = arith.constant dense<0.000000e+00> : vector<8x32xf32>
    %23 = tpu.matmul %22, %3, %cst_13 {dimension_numbers = #tpu.dot_dimension_numbers<[1], [0], [0], [1], [0, 0, 1, 1], [], []>} : vector<8x32xf32>, vector<32x32xf32>, vector<8x32xf32> -> vector<8x32xf32>
    %24 = vector.broadcast %4 : vector<1x32xf32> to vector<8x32xf32>
    %25 = arith.addf %23, %24 : vector<8x32xf32>
    %c1 = arith.constant 1 : index
    %c0_14 = arith.constant 0 : index
    %26 = vector.load %arg9[%c1, %c0_14] : memref<2x32xf32, #tpu.memory_space<vmem>>, vector<1x32xf32>
    %27 = vector.broadcast %26 : vector<1x32xf32> to vector<8x32xf32>
    %28 = arith.addf %25, %27 : vector<8x32xf32>
    %29 = math.tanh %28 : vector<8x32xf32>
    %30 = vector.broadcast %5 : vector<1x32xf32> to vector<8x32xf32>
    %31 = arith.mulf %29, %30 : vector<8x32xf32>
    %cst_15 = arith.constant dense<0.000000e+00> : vector<8xf32>
    %32 = vector.multi_reduction <add>, %31, %cst_15 [1] : vector<8x32xf32> to vector<8xf32>
    %33 = vector.shape_cast %32 : vector<8xf32> to vector<8x1xf32>
    %34 = arith.index_cast %7 : i32 to index
    %c1_16 = arith.constant 1 : index
    %35 = vector.load %arg8[%34, %c1_16] : memref<8x2xf32, #tpu.memory_space<vmem>>, vector<8x1xf32>
    tpu.vector_store %arg8[%34, %c1_16], %33 {strides = array<i32>} : memref<8x2xf32, #tpu.memory_space<vmem>>, vector<8x1xf32>,
    %c0_i32_17 = arith.constant 0 : i32
    %36 = arith.cmpi eq, %arg0, %c0_i32_17 : i32
    %37 = arith.extui %36 : i1 to i32
    %c0_i32_18 = arith.constant 0 : i32
    %38 = arith.cmpi ne, %37, %c0_i32_18 : i32
    scf.if %38 {
      %c0_19 = arith.constant 0 : index
      %c0_20 = arith.constant 0 : index
      %39 = vector.load %arg8[%c0_19, %c0_20] : memref<8x2xf32, #tpu.memory_space<vmem>>, vector<8x2xf32>
      %cst_21 = arith.constant dense<0xFF800000> : vector<2xf32>
      %40 = vector.multi_reduction <maximumf>, %39, %cst_21 [0] : vector<8x2xf32> to vector<2xf32>
      %41 = vector.shape_cast %40 : vector<2xf32> to vector<1x2xf32>
      %42 = vector.broadcast %41 : vector<1x2xf32> to vector<8x2xf32>
      %43 = arith.subf %39, %42 : vector<8x2xf32>
      %44 = math.exp %43 : vector<8x2xf32>
      %cst_22 = arith.constant dense<0.000000e+00> : vector<2xf32>
      %45 = vector.multi_reduction <add>, %44, %cst_22 [0] : vector<8x2xf32> to vector<2xf32>
      %46 = vector.shape_cast %45 : vector<2xf32> to vector<1x2xf32>
      %47 = tpu.reciprocal %46 {approx = true} : vector<1x2xf32> -> vector<1x2xf32>
      %48 = arith.mulf %46, %47 : vector<1x2xf32>
      %cst_23 = arith.constant 2.000000e+00 : f32
      %49 = vector.broadcast %cst_23 : f32 to vector<1x2xf32>
      %50 = arith.subf %49, %48 : vector<1x2xf32>
      %51 = arith.mulf %47, %50 : vector<1x2xf32>
      %52 = vector.broadcast %51 : vector<1x2xf32> to vector<8x2xf32>
      %53 = arith.mulf %44, %52 : vector<8x2xf32>
      %c0_24 = arith.constant 0 : index
      %c0_25 = arith.constant 0 : index
      %54 = vector.load %arg8[%c0_24, %c0_25] : memref<8x2xf32, #tpu.memory_space<vmem>>, vector<8x2xf32>
      tpu.vector_store %arg8[%c0_24, %c0_25], %53 {strides = array<i32>} : memref<8x2xf32, #tpu.memory_space<vmem>>, vector<8x2xf32>,
    } else {
    }
    return
  }
  func.func @transform_0(%arg0: i32) -> (i32, i32) {
    %c0_i32 = arith.constant 0 : i32
    %c0_i32_0 = arith.constant 0 : i32
    return %arg0, %c0_i32 : i32, i32
  }
  func.func @transform_1(%arg0: i32) -> (i32, i32) {
    %c0_i32 = arith.constant 0 : i32
    %c0_i32_0 = arith.constant 0 : i32
    %c0_i32_1 = arith.constant 0 : i32
    return %c0_i32, %c0_i32_0 : i32, i32
  }
  func.func @transform_2(%arg0: i32) -> (i32, i32) {
    %c0_i32 = arith.constant 0 : i32
    %c0_i32_0 = arith.constant 0 : i32
    %c0_i32_1 = arith.constant 0 : i32
    return %c0_i32, %c0_i32_0 : i32, i32
  }
  func.func @transform_3(%arg0: i32) -> (i32, i32) {
    %c0_i32 = arith.constant 0 : i32
    %c0_i32_0 = arith.constant 0 : i32
    %c0_i32_1 = arith.constant 0 : i32
    return %c0_i32, %c0_i32_0 : i32, i32
  }
  func.func @transform_4(%arg0: i32) -> (i32, i32) {
    %c0_i32 = arith.constant 0 : i32
    %c0_i32_0 = arith.constant 0 : i32
    %c0_i32_1 = arith.constant 0 : i32
    return %c0_i32, %c0_i32_0 : i32, i32
  }
  func.func @transform_5(%arg0: i32) -> (i32, i32) {
    %c0_i32 = arith.constant 0 : i32
    %c0_i32_0 = arith.constant 0 : i32
    %c0_i32_1 = arith.constant 0 : i32
    return %c0_i32, %c0_i32_0 : i32, i32
  }
  func.func @transform_6(%arg0: i32) -> (i32, i32) {
    %c0_i32 = arith.constant 0 : i32
    %c0_i32_0 = arith.constant 0 : i32
    %c0_i32_1 = arith.constant 0 : i32
    return %c0_i32, %c0_i32_0 : i32, i32
  }
  func.func @transform_7(%arg0: i32) -> (i32, i32) {
    %c0_i32 = arith.constant 0 : i32
    %c0_i32_0 = arith.constant 0 : i32
    %c0_i32_1 = arith.constant 0 : i32
    return %c0_i32, %c0_i32_0 : i32, i32
  }
}

</mosaic_0001>

<bundles_post_ra>
// kernel: subject_attention.1
= control target key start
LH: loop header
LB: loop body
LE: loop exit
PB: predicated region body
PF: predicated region fallthrough
CT: control target
= control target key end

     0   :  { %12 = vsyncpa [#allocation4], 0  ;;  %s651_s0 = inlined_call_operand.vmem [shape: f32[8,64], index: 0, kind: input, shape index: {}]   ;;  %s652_s1 = inlined_call_operand.hbm [shape: f32[2,16], index: 1, kind: input, shape index: {}]   ;;  %s653_s2 = inlined_call_operand.vmem [shape: f32[32,32], index: 2, kind: input, shape index: {}]   ;;  %s654_s3 = inlined_call_operand.vmem [shape: f32[1,32], index: 3, kind: input, shape index: {}]   ;;  %s655_s4 = inlined_call_operand.hbm [shape: f32[16,32], index: 4, kind: input, shape index: {}]   ;;  %s656_s5 = inlined_call_operand.hbm [shape: f32[1,32], index: 5, kind: input, shape index: {}]   ;;  %s657_s6 = inlined_call_operand.hbm [shape: f32[1,32], index: 6, kind: input, shape index: {}]   ;;  %s658_s7 = inlined_call_operand.vmem [shape: f32[8,2], index: 7, kind: output, shape index: {}]  }
   0x1   :  { %13 = vsyncpa [#allocation6], 0 }
   0x2   :  { %14 = vsyncpa [#allocation9], 0  ;;  %s550_s24 = smov [#allocation5]  }
   0x3   :  { %s36_s25 = sshll.u32 %s550_s24, 4  ;;  %s37_s25 = int_to_ptr.vmem [resolvable:$true] %s36_s25 }
   0x4   :  { %s472_s26 = scalar_lea.vmem %s37_s25, 256  ;;  %p477_p1 = scmp.lt.s32.totalorder %s37_s25, %s37_s25 }
   0x5   :  { %p473_p0 = scmp.ne.s32.totalorder %s37_s25, %s472_s26  ;;  %p478_p2 = scmp.lt.s32.totalorder %s472_s26, %s472_s26 }
   0x7   :  { %p479_p3 = por %p478_p2, %p477_p1 }
   0x9   :  { %p480_p4 = pnand %p479_p3, %p473_p0 }
   0xb   :  { %483 = shalt.err (!%p480_p4)
}
   0xc   :  { %s551_s27 = smov 128   ;;  %s552_s28 = smov 8  }
   0xd   :  { %42 = dma.hbm_to_vmem [thread:$0]  %s655_s4, 256, %s37_s25, [#allocation6], %s551_s27, %s551_s27, %s552_s28  }
   0xe   :  { %s553_s8 = smov [#allocation3]   ;;  %s554_s10 = smov [#allocation7]  }
   0xf   :  { %s23_s9 = sshll.u32 %s553_s8, 4  ;;  %s49_s11 = sshll.u32 %s554_s10, 4  ;;  %s24_s9 = int_to_ptr.vmem [resolvable:$true] %s23_s9  ;;  %s50_s11 = int_to_ptr.vmem [resolvable:$true] %s49_s11 }
  0x10   :  { %s492_s12 = scalar_lea.vmem %s24_s9, 32  ;;  %p497_p6 = scmp.lt.s32.totalorder %s24_s9, %s24_s9 }
  0x11   :  { %p493_p5 = scmp.ne.s32.totalorder %s24_s9, %s492_s12  ;;  %p498_p7 = scmp.lt.s32.totalorder %s492_s12, %s492_s12 }
  0x13   :  { %p499_p8 = por %p498_p7, %p497_p6 }
  0x15   :  { %p500_p9 = pnand %p499_p8, %p493_p5 }
  0x17   :  { %503 = shalt.err (!%p500_p9)
}
  0x18   :  { %26 = dma.hbm_to_vmem [thread:$0]  %s652_s1, 32, %s24_s9, [#allocation4]  }
  0x19   :  { %s512_s15 = scalar_lea.vmem %s50_s11, 16  ;;  %s516_s4 = scalar_lea.vmem %s50_s11, 32 }
  0x1a   :  { %p513_p10 = scmp.ne.s32.totalorder %s50_s11, %s512_s15  ;;  %p517_p11 = scmp.lt.s32.totalorder %s50_s11, %s50_s11 }
  0x1b   :  { %p518_p12 = scmp.lt.s32.totalorder %s516_s4, %s512_s15 }
  0x1d   :  { %p519_p13 = por %p518_p12, %p517_p11 }
  0x1f   :  { %p520_p0 = pnand %p519_p13, %p513_p10 }
  0x21   :  { %523 = shalt.err (!%p520_p0)
}
  0x22   :  { %52 = dma.hbm_to_vmem [thread:$0]  %s656_s5, 16, %s50_s11, [#allocation6]  }
  0x23   :  { %s555_s18 = smov [#allocation8]  }
  0x24   :  { %s59_s19 = sshll.u32 %s555_s18, 4  ;;  %s60_s19 = int_to_ptr.vmem [resolvable:$true] %s59_s19 }
  0x25   :  { %s532_s20 = scalar_lea.vmem %s60_s19, 16  ;;  %s536_s21 = scalar_lea.vmem %s60_s19, 32 }
  0x26   :  { %p533_p1 = scmp.ne.s32.totalorder %s60_s19, %s532_s20  ;;  %p537_p2 = scmp.lt.s32.totalorder %s60_s19, %s60_s19 }
  0x27   :  { %p538_p3 = scmp.lt.s32.totalorder %s536_s21, %s532_s20 }
  0x29   :  { %p539_p4 = por %p538_p3, %p537_p2 }
  0x2b   :  { %p540_p5 = pnand %p539_p4, %p533_p1 }
  0x2d   :  { %543 = shalt.err (!%p540_p5)
}
  0x2e   :  { %62 = dma.hbm_to_vmem [thread:$0]  %s657_s6, 16, %s60_s19, [#allocation9]  }
  0x2f   :  { %544 = dma.done.wait [#allocation4], 32  }
  0x30   :  { %545 = vsyncadd [#allocation4], 4294967264 }
  0x31   :  { %546 = dma.done.wait [#allocation6], 272  }
  0x32   :  { %547 = vsyncadd [#allocation6], 4294967024 }
  0x33   :  { %548 = dma.done.wait [#allocation9], 16  }
  0x34   :  { %549 = vsyncadd [#allocation9], 4294967280  ;;  %v556_v0 = vmov 0.0   ;;  %vm557_vm0 = vmmov 0   ;;  %v273_v1 = vld [vmem:[%s651_s0] sm:$0xff]  ;;  %v81_v2 = vld [vmem:[#allocation5 + $0x8] sm:$0xff] }
  0x35   :  { %418 = vmatprep.subr.mxu0 %v556_v0  ;;  %422 = vmatprep.mubr.msk.f32.mxu0 %vm557_vm0, %v556_v0  ;;  %v80_v3 = vld [vmem:[#allocation5] sm:$0xff]  ;;  %s558_s6 = smov 96   ;;  %v79_v4 = vld [vmem:[#allocation3] sm:$0x3]  ;;  %vm89_vm1 = vcmask 130048   ;;  %v168_v5 = vld [vmem:[%s653_s2 + $0x18] sm:$0xff] }
  0x36   :  { %425 = vmatprep.subr.mxu1 %v556_v0  ;;  %433 = vmatprep.mubr.msk.f32.mxu1 %vm557_vm0, %v556_v0  ;;  %v167_v6 = vld [vmem:[%s653_s2 + $0x10] sm:$0xff]  ;;  %v166_v7 = vld [vmem:[%s653_s2 + $0x8] sm:$0xff]  ;;  %v165_v8 = vld [vmem:[%s653_s2] sm:$0xff]  ;;  %vm179_vm2 = vcmask 261120   ;;  %vm163_vm3 = vcmask 254976   ;;  %vm271_vm4 = vcmask 7168  }
  0x37   :  { %275 = vrot.lane.b32.xlu0 %v273_v1, %s558_s6  ;;  %419 = vmatpush3.msra.mxu0 %v81_v2  ;;  %v397_v10 = vld [vmem:[#allocation7] ss:$0 sm:$0xff]  ;;  %v399_v14 = vld [vmem:[%s654_s3] ss:$0 sm:$0xff]  ;;  %v402_v20 = vld [vmem:[#allocation8] ss:$0 sm:$0xff] }
  0x38   :  { %420 = vmatprep.subr.mxu0 %v556_v0  ;;  %426 = vmatpush3.msra.mxu1 %v168_v5  ;;  %vm360_vm5 = vcmask 15368   ;;  %vm366_vm6 = vcmask 15360  }
  0x39   :  { %421 = vmatpush3.msra.mxu0 %v80_v3  ;;  %427 = vmatprep.subr.mxu1 %v556_v0 }
  0x3a   :  { %423 = vmatmul.mubr.msk.f32.vlgmr.msra.gmra.mxu0 %vm89_vm1, %v79_v4  ;;  %428 = vmatpush3.msra.mxu1 %v167_v6 }
  0x3b   :  { %436 = vmatprep.subr.mxu0 %v556_v0  ;;  %429 = vmatprep.subr.mxu1 %v556_v0 }
  0x3c   :  { %437 = vmatpush3.msra.mxu0 %v168_v5  ;;  %430 = vmatpush3.msra.mxu1 %v166_v7 }
  0x3d   :  { %438 = vmatprep.subr.mxu0 %v556_v0  ;;  %431 = vmatprep.subr.mxu1 %v556_v0 }
  0x3e   :  { %439 = vmatpush3.msra.mxu0 %v167_v6  ;;  %432 = vmatpush3.msra.mxu1 %v165_v8 }
  0x3f   :  { %440 = vmatprep.subr.mxu0 %v556_v0  ;;  %434 = vmatmul.mubr.msk.f32.vlgmr.msra.gmra.mxu1 %vm179_vm2, %v273_v1 }
  0x40   :  { %441 = vmatpush3.msra.mxu0 %v166_v7  ;;  %444 = vmatprep.mubr.msk.f32.mxu0 %vm557_vm0, %v556_v0 }
  0x41   :  { %442 = vmatprep.subr.mxu0 %v556_v0 }
  0x42   :  { %443 = vmatpush3.msra.mxu0 %v165_v8 }
  0xa9   :  { %v276_v9 = vpop.permute.xlu0 %275 }
  0xaa   :  { %445 = vmatmul.mubr.msk.f32.vlgmr.msra.gmra.mxu0 %vm179_vm2, %v276_v9 }
  0xfa   :  { %v159_v11 = vpop.f32.mrf.mxu0 }
  0xfb   :  { %v160_v12 = vadd.f32 %v397_v10, %v159_v11 }
  0xfc   :  { %v424_v13 = vpop.f32.mrf.mxu0 }
  0xfd   :  { %164 = vst.msk [vmem:[#allocation2] sm:$0x3] %vm163_vm3, %v160_v12 }
  0xff   :  { %v249_v15 = vpop.f32.mrf.mxu1 }
 0x100   :  { %v250_v16 = vadd.f32 %v399_v14, %v249_v15 }
 0x101   :  { %v435_v17 = vpop.f32.mrf.mxu1 }
 0x104   :  { %v401_v18 = vld [vmem:[#allocation2] ss:$0 sm:$0xff]  ;;  %v404_v25 = vld [vmem:[#allocation2 + $0x1] ss:$0 sm:$0xff] }
 0x105   :  { %v258_v19 = vadd.f32 %v401_v18, %v250_v16 }
 0x107   :  { %456 = vtanh.f32 %v258_v19 }
 0x114   :  { %v457_v21 = vpop.eup %456 }
 0x115   :  { %v266_v22 = vmul.f32 %v457_v21, %v402_v20 }
 0x117   :  { %v267_v23 = vsel %vm179_vm2, %v266_v22, 0.0 }
 0x118   :  { %268 = vadd.xlane.f32.xlu0 %v267_v23 }
 0x16a   :  { %v345_v24 = vpop.f32.mrf.mxu0 }
 0x16b   :  { %v346_v26 = vadd.f32 %v399_v14, %v345_v24 }
 0x16c   :  { %v446_v27 = vpop.f32.mrf.mxu0 }
 0x16d   :  { %v354_v28 = vadd.f32 %v404_v25, %v346_v26 }
 0x16f   :  { %458 = vtanh.f32 %v354_v28 }
 0x17c   :  { %v459_v29 = vpop.eup %458 }
 0x17d   :  { %v356_v30 = vmul.f32 %v459_v29, %v402_v20 }
 0x17f   :  { %v357_v31 = vsel %vm179_vm2, %v356_v30, 0.0 }
 0x180   :  { %358 = vadd.xlane.f32.xlu1 %v357_v31 }
 0x1a1   :  { %v269_v32 = vpop.xlane.xlu0 %268 }
 0x1a2   :  { %272 = vst.msk [vmem:[%s658_s7] sm:$0xff] %vm271_vm4, %v269_v32 }
 0x209   :  { %v359_v33 = vpop.xlane.xlu1 %358 }
 0x20a   :  { %361 = vst.msk [vmem:[%s658_s7] sm:$0xff] %vm360_vm5, %v359_v33 }
 0x211   :  { %v365_v34 = vld [vmem:[%s658_s7] sm:$0xff] }
 0x212   :  { %v367_v35 = vsel %vm366_vm6, %v365_v34, -inf }
 0x213   :  { %v368_v36 = vrot.slane %v367_v35, 4 }
 0x215   :  { %v369_v37 = vmax.f32 %v367_v35, %v368_v36 }
 0x217   :  { %v370_v38 = vrot.slane %v369_v37, 2 }
 0x219   :  { %v371_v39 = vmax.f32 %v369_v37, %v370_v38 }
 0x21b   :  { %v372_v40 = vrot.slane %v371_v39, 1 }
 0x21d   :  { %v373_v41 = vmax.f32 %v371_v39, %v372_v40 }
 0x21f   :  { %v374_v42 = vsub.f32 %v365_v34, %v373_v41 }
 0x221   :  { %v375_v43 = vmul.f32 1.442695, %v374_v42 }
 0x223   :  { %460 = vpow2.f32 %v375_v43 }
 0x230   :  { %v461_v44 = vpop.eup %460 }
 0x231   :  { %v377_v45 = vsel %vm366_vm6, %v461_v44, 0.0 }
 0x232   :  { %v378_v46 = vrot.slane %v377_v45, 4 }
 0x234   :  { %v379_v47 = vadd.f32 %v378_v46, %v377_v45 }
 0x236   :  { %v380_v48 = vrot.slane %v379_v47, 2 }
 0x238   :  { %v381_v49 = vadd.f32 %v380_v48, %v379_v47 }
 0x23a   :  { %v382_v50 = vrot.slane %v381_v49, 1 }
 0x23c   :  { %v383_v51 = vadd.f32 %v382_v50, %v381_v49 }
 0x23e   :  { %462 = vrcp.f32 %v383_v51 }
 0x24b   :  { %v463_v52 = vpop.eup %462 }
 0x24c   :  { %v385_v53 = vmul.f32 %v463_v52, %v383_v51 }
 0x24e   :  { %v386_v54 = vsub.f32 2.0, %v385_v53 }
 0x250   :  { %v387_v55 = vmul.f32 %v463_v52, %v386_v54 }
 0x252   :  { %v388_v56 = vmul.f32 %v461_v44, %v387_v55 }
 0x254   :  { %389 = vst.msk [vmem:[%s658_s7] sm:$0xff] %vm366_vm6, %v388_v56 }
 0x255   :  { %394 = vsyncpa [#allocation4], 1 }
 0x256   :  { %395 = vsyncpa [#allocation6], 1 }
 0x257   :  { %396 = vsyncpa [#allocation9], 1 }

</bundles_post_ra>
